<compile_context>
chip_gen: v6e
topology: v6e:2x2x1
jax: 0.10.0
libtpu: 0.0.40
codegen_flags: <defaults>
</compile_context>

<pallas_src>
import functools

import jax
import jax.numpy as jnp
from jax.experimental import pallas as pl
from jax.experimental.pallas import tpu as pltpu

NP = 128  # padded output lane width -> one lane-dense (unmasked) vst region


def _ensemble_mlp_kernel(x_ref, w1_ref, b1_ref, w2_ref, b2_ref, out_ref):
    """One invocation computes all M ensemble members.

    x_ref  : [B, D]        f32   shared input
    w1_ref : [D, M*HID]    bf16  all members' first-layer weights, fused
    b1_ref : [1, M*HID]    f32
    w2_ref : [M*HID, 128]  bf16  block-diagonal second-layer weights
    b2_ref : [1, 128]      f32   per-member biases packed along lanes
    out_ref: [B, 128]      f32   lane-dense slab; wrapper strips padding
    """
    x = x_ref[...].astype(jnp.bfloat16)

    # Layer 1 for ALL members at once: one MXU matmul, f32 accumulation.
    h = jnp.dot(x, w1_ref[...], preferred_element_type=jnp.float32)  # [B, M*HID]
    h = jnp.maximum(h + b1_ref[...], 0.0)                            # f32 epilogue
    h = h.astype(jnp.bfloat16)

    # Layer 2 for ALL members: one block-structured matmul into a single
    # 128-wide lane-dense output slab (zero blocks cost nothing here -
    # the MXU has enormous slack in this HBM-/overhead-bound regime).
    logits = jnp.dot(h, w2_ref[...], preferred_element_type=jnp.float32)  # [B, 128]
    out_ref[...] = (logits + b2_ref[...]).astype(out_ref.dtype)


def prepare_ensemble_weights(w1, b1, w2, b2):
    """One-time weight packing (call once; reuse the result every forward).

    w1: [M, D, HID]   b1: [M, 1, HID]   w2: [M, HID, NCLS]   b2: [M, 1, NCLS]
    Returns packed device arrays: (w1_all, b1_all, w2_blk, b2_blk, M, NCLS).
    """
    M, D, HID = w1.shape
    NCLS = w2.shape[-1]
    assert M * NCLS <= NP, "block-diagonal layer-2 packing needs M*NCLS <= 128"

    # Fused layer-1 weights: [D, M*HID], bf16 streaming.
    w1_all = jnp.transpose(w1, (1, 0, 2)).reshape(D, M * HID).astype(jnp.bfloat16)
    b1_all = jnp.transpose(b1, (1, 0, 2)).reshape(1, M * HID).astype(jnp.float32)

    # Block-diagonal layer-2 weights: member m in rows m*HID:(m+1)*HID and
    # lanes m*NCLS:(m+1)*NCLS; zeros elsewhere; lane-padded to 128.
    w2_blk = jnp.zeros((M * HID, NP), dtype=jnp.float32)
    b2_blk = jnp.zeros((1, NP), dtype=jnp.float32)
    for m in range(M):
        w2_blk = w2_blk.at[m * HID:(m + 1) * HID,
                           m * NCLS:(m + 1) * NCLS].set(w2[m].astype(jnp.float32))
        b2_blk = b2_blk.at[:, m * NCLS:(m + 1) * NCLS].set(
            b2[m].reshape(1, NCLS).astype(jnp.float32))
    w2_blk = w2_blk.astype(jnp.bfloat16)

    # Materialize on device once so the per-call forward does zero repacking.
    return (jax.device_put(w1_all), jax.device_put(b1_all),
            jax.device_put(w2_blk), jax.device_put(b2_blk), M, NCLS)


@functools.partial(jax.jit, static_argnums=(5, 6))
def ensemble_forward(x_nchw, w1_all, b1_all, w2_blk, b2_blk, M, NCLS):
    """Runs all ensemble members; returns stacked logits [M, B, NCLS].

    The module's list of per-member logits is just `list(result)`; returning
    the stacked array avoids emitting M separate slice kernels here.
    """
    B = x_nchw.shape[0]
    D = x_nchw.shape[1] * x_nchw.shape[2] * x_nchw.shape[3]
    x2d = x_nchw.reshape(B, D).astype(jnp.float32)

    out = pl.pallas_call(
        _ensemble_mlp_kernel,
        out_shape=jax.ShapeDtypeStruct((B, NP), jnp.float32),
        in_specs=[pl.BlockSpec(memory_space=pltpu.MemorySpace.VMEM)] * 5,
        out_specs=pl.BlockSpec(memory_space=pltpu.MemorySpace.VMEM),
        compiler_params=pltpu.CompilerParams(
            # Whole-loaded bf16 W1 block; raise scoped VMEM (v5e defaults to
            # 16 MiB) so larger-than-toy weights still compile. Re-derive /
            # K-tile when targeting v7x (64 MiB physical) at real sizes.
            vmem_limit_bytes=64 << 20,
        ),
    )(x2d, w1_all, b1_all, w2_blk, b2_blk)

    # [B, 128] slab: lanes [m*NCLS:(m+1)*NCLS] hold member m's logits.
    return out[:, :M * NCLS].reshape(B, M, NCLS).transpose(1, 0, 2)


if __name__ == "__main__":
    # Small shapes consistent with the module's forward (NCHW image input).
    B, C, H, W = 2, 4, 16, 16
    D = C * H * W          # 1024
    HID = 128
    NCLS = 8
    M = 3                  # number of ensemble members

    key = jax.random.PRNGKey(0)
    kx, k1, k2, k3, k4 = jax.random.split(key, 5)

    x = jax.random.normal(kx, (B, C, H, W), dtype=jnp.float32)
    w1 = jax.random.normal(k1, (M, D, HID), dtype=jnp.float32) * 0.02
    b1 = jax.random.normal(k2, (M, 1, HID), dtype=jnp.float32) * 0.02
    w2 = jax.random.normal(k3, (M, HID, NCLS), dtype=jnp.float32) * 0.02
    b2 = jax.random.normal(k4, (M, 1, NCLS), dtype=jnp.float32) * 0.02

    # One-time weight packing (hoisted out of the per-call forward).
    packed = prepare_ensemble_weights(w1, b1, w2, b2)

    logits = ensemble_forward(x, *packed)   # [M, B, NCLS]
    jax.block_until_ready(logits)

    # EnsembleClassifier.forward returns a list of per-member logits:
    logit_list = list(logits)

    # Reference check in plain JAX (same bf16 weight rounding, f32 accumulation).
    x2d = x.reshape(B, D).astype(jnp.bfloat16)
    w1_b = w1.astype(jnp.bfloat16)
    w2_b = w2.astype(jnp.bfloat16)
    ok = True
    for m in range(M):
        h = jnp.dot(x2d, w1_b[m], preferred_element_type=jnp.float32) + b1[m]
        h = jnp.maximum(h, 0.0).astype(jnp.bfloat16)
        ref = jnp.dot(h, w2_b[m], preferred_element_type=jnp.float32) + b2[m]
        ok = ok and bool(jnp.allclose(ref, logit_list[m], atol=1e-3, rtol=1e-3))

    print("KERNEL_OK" if ok else "MISMATCH")
</pallas_src>

<mosaic_0001>
module attributes {stable_mosaic.version = 11 : i64} {
  func.func @_ensemble_mlp_kernel(%arg0: memref<2x1024xf32, #tpu.memory_space<vmem>>, %arg1: memref<1024x384xbf16, #tpu.memory_space<vmem>>, %arg2: memref<1x384xf32, #tpu.memory_space<vmem>>, %arg3: memref<384x128xbf16, #tpu.memory_space<vmem>>, %arg4: memref<1x128xf32, #tpu.memory_space<vmem>>, %arg5: memref<2x128xf32, #tpu.memory_space<vmem>>) attributes {dimension_semantics = [], scalar_prefetch = 0 : i64, scratch_operands = 0 : i64, tpu.core_type = #tpu.core_type<tc>} {
    %c0 = arith.constant 0 : index
    %c0_0 = arith.constant 0 : index
    %0 = vector.load %arg0[%c0, %c0_0] : memref<2x1024xf32, #tpu.memory_space<vmem>>, vector<2x1024xf32>
    %1 = arith.truncf %0 : vector<2x1024xf32> to vector<2x1024xbf16>
    %c0_1 = arith.constant 0 : index
    %c0_2 = arith.constant 0 : index
    %2 = vector.load %arg1[%c0_1, %c0_2] : memref<1024x384xbf16, #tpu.memory_space<vmem>>, vector<1024x384xbf16>
    %cst = arith.constant dense<0.000000e+00> : vector<2x384xf32>
    %3 = tpu.matmul %1, %2, %cst {dimension_numbers = #tpu.dot_dimension_numbers<[1], [0], [0], [1], [0, 0, 1, 1], [], []>} : vector<2x1024xbf16>, vector<1024x384xbf16>, vector<2x384xf32> -> vector<2x384xf32>
    %c0_3 = arith.constant 0 : index
    %c0_4 = arith.constant 0 : index
    %4 = vector.load %arg2[%c0_3, %c0_4] : memref<1x384xf32, #tpu.memory_space<vmem>>, vector<1x384xf32>
    %5 = vector.broadcast %4 : vector<1x384xf32> to vector<2x384xf32>
    %6 = arith.addf %3, %5 : vector<2x384xf32>
    %cst_5 = arith.constant 0.000000e+00 : f32
    %7 = vector.broadcast %cst_5 : f32 to vector<2x384xf32>
    %8 = arith.maximumf %6, %7 : vector<2x384xf32>
    %9 = arith.truncf %8 : vector<2x384xf32> to vector<2x384xbf16>
    %c0_6 = arith.constant 0 : index
    %c0_7 = arith.constant 0 : index
    %10 = vector.load %arg3[%c0_6, %c0_7] : memref<384x128xbf16, #tpu.memory_space<vmem>>, vector<384x128xbf16>
    %cst_8 = arith.constant dense<0.000000e+00> : vector<2x128xf32>
    %11 = tpu.matmul %9, %10, %cst_8 {dimension_numbers = #tpu.dot_dimension_numbers<[1], [0], [0], [1], [0, 0, 1, 1], [], []>} : vector<2x384xbf16>, vector<384x128xbf16>, vector<2x128xf32> -> vector<2x128xf32>
    %c0_9 = arith.constant 0 : index
    %c0_10 = arith.constant 0 : index
    %12 = vector.load %arg4[%c0_9, %c0_10] : memref<1x128xf32, #tpu.memory_space<vmem>>, vector<1x128xf32>
    %13 = vector.broadcast %12 : vector<1x128xf32> to vector<2x128xf32>
    %14 = arith.addf %11, %13 : vector<2x128xf32>
    %c0_11 = arith.constant 0 : index
    %c0_12 = arith.constant 0 : index
    %15 = vector.load %arg5[%c0_11, %c0_12] : memref<2x128xf32, #tpu.memory_space<vmem>>, vector<2x128xf32>
    tpu.vector_store %arg5[%c0_11, %c0_12], %14 {strides = array<i32>} : memref<2x128xf32, #tpu.memory_space<vmem>>, vector<2x128xf32>,
    return
  }
}

</mosaic_0001>

<bundles_post_ra>
// kernel: ensemble_forward.1
= control target key start
LH: loop header
LB: loop body
LE: loop exit
PB: predicated region body
PF: predicated region fallthrough
CT: control target
= control target key end

     0   :  { %10 = vsyncpa [#allocation3], 0  ;;  %s2823_s0 = inlined_call_operand.vmem [shape: f32[2,1024], index: 0, kind: input, shape index: {}]   ;;  %s2824_s1 = inlined_call_operand.hbm [shape: bf16[1024,384], index: 1, kind: input, shape index: {}]   ;;  %s2825_s2 = inlined_call_operand.vmem [shape: f32[1,384], index: 2, kind: input, shape index: {}]   ;;  %s2826_s3 = inlined_call_operand.hbm [shape: bf16[384,128], index: 3, kind: input, shape index: {}]   ;;  %s2827_s4 = inlined_call_operand.vmem [shape: f32[1,128], index: 4, kind: input, shape index: {}]   ;;  %s2828_s5 = inlined_call_operand.vmem [shape: f32[2,128], index: 5, kind: output, shape index: {}]  }
   0x1   :  { %11 = vsyncpa [#allocation5], 0  ;;  %s2707_s18 = smov [#allocation2]  }
   0x2   :  { %s19_s19 = sshll.u32 %s2707_s18, 4  ;;  %s20_s19 = int_to_ptr.vmem [resolvable:$true] %s19_s19 }
   0x3   :  { %s2671_s20 = scalar_lea.vmem %s20_s19, 24576  ;;  %p2676_p1 = scmp.lt.s32.totalorder %s20_s19, %s20_s19 }
   0x4   :  { %p2672_p0 = scmp.ne.s32.totalorder %s20_s19, %s2671_s20  ;;  %p2677_p2 = scmp.lt.s32.totalorder %s2671_s20, %s2671_s20 }
   0x6   :  { %p2678_p3 = por %p2677_p2, %p2676_p1 }
   0x8   :  { %p2679_p4 = pnand %p2678_p3, %p2672_p0 }
   0xa   :  { %2682 = shalt.err (!%p2679_p4)
}
   0xb   :  { %s2708_s21 = smov 192   ;;  %s2709_s22 = smov 12  }
   0xc   :  { %25 = dma.hbm_to_vmem [thread:$0]  %s2824_s1, 24576, %s20_s19, [#allocation3], %s2708_s21, %s2708_s21, %s2709_s22  }
   0xd   :  { %s2710_s25 = smov [#allocation4]  }
   0xe   :  { %s33_s26 = sshll.u32 %s2710_s25, 4  ;;  %s34_s26 = int_to_ptr.vmem [resolvable:$true] %s33_s26 }
   0xf   :  { %s2691_s27 = scalar_lea.vmem %s34_s26, 3072  ;;  %p2696_p6 = scmp.lt.s32.totalorder %s34_s26, %s34_s26 }
  0x10   :  { %p2692_p5 = scmp.ne.s32.totalorder %s34_s26, %s2691_s27  ;;  %p2697_p7 = scmp.lt.s32.totalorder %s2691_s27, %s2691_s27 }
  0x12   :  { %p2698_p8 = por %p2697_p7, %p2696_p6 }
  0x14   :  { %p2699_p9 = pnand %p2698_p8, %p2692_p5 }
  0x16   :  { %2702 = shalt.err (!%p2699_p9)
}
  0x17   :  { %s2711_s28 = smov 64   ;;  %s2712_s29 = smov 4  }
  0x18   :  { %39 = dma.hbm_to_vmem [thread:$0]  %s2826_s3, 3072, %s34_s26, [#allocation5], %s2711_s28, %s2711_s28, %s2712_s29  }
  0x19   :  { %2703 = dma.done.wait [#allocation3], 24576  }
  0x1a   :  { %2704 = vsyncadd [#allocation3], 4294942720 }
  0x1b   :  { %2705 = dma.done.wait [#allocation5], 3072  }
  0x1c   :  { %2706 = vsyncadd [#allocation5], 4294964224  ;;  %v2381_v0 = vld [vmem:[#allocation2 + $0xac] ss:$12 sps:$4 sm:$0xff]   ;;  %v2385_v2 = vld [vmem:[#allocation2 + $0xa8] ss:$12 sps:$4 sm:$0xff]   ;;  %v57_v38 = vlaneseq }
  0x1d   :  { %v2383_v1 = vld [vmem:[#allocation2 + $0x22c] ss:$12 sps:$4 sm:$0xff]   ;;  %1400 = vmatprep.subr.bf16.mxu0 %v2381_v0  ;;  %v2386_v3 = vld [vmem:[#allocation2 + $0x228] ss:$12 sps:$4 sm:$0xff]   ;;  %v2391_v6 = vld [vmem:[#allocation2 + $0x90] ss:$12 sps:$4 sm:$0xff]  }
  0x1e   :  { %1441 = vmatprep.subr.bf16.mxu1 %v2383_v1  ;;  %v2387_v4 = vld [vmem:[#allocation2 + $0x94] ss:$12 sps:$4 sm:$0xff]   ;;  %1401 = vmatpush1.bf16.msra.mxu0 %v2385_v2  ;;  %v2392_v7 = vld [vmem:[#allocation2 + $0x210] ss:$12 sps:$4 sm:$0xff]   ;;  %v2397_v10 = vld [vmem:[#allocation2 + $0x78] ss:$12 sps:$4 sm:$0xff]  }
  0x1f   :  { %1442 = vmatpush1.bf16.msra.mxu1 %v2386_v3  ;;  %v2389_v5 = vld [vmem:[#allocation2 + $0x214] ss:$12 sps:$4 sm:$0xff]   ;;  %1402 = vmatprep.subr.bf16.mxu0 %v2387_v4  ;;  %v2393_v8 = vld [vmem:[#allocation2 + $0x7c] ss:$12 sps:$4 sm:$0xff]   ;;  %v2398_v11 = vld [vmem:[#allocation2 + $0x1f8] ss:$12 sps:$4 sm:$0xff]  }
  0x20   :  { %1443 = vmatprep.subr.bf16.mxu1 %v2389_v5  ;;  %v2395_v9 = vld [vmem:[#allocation2 + $0x1fc] ss:$12 sps:$4 sm:$0xff]   ;;  %v2399_v12 = vld [vmem:[#allocation2 + $0x64] ss:$12 sps:$4 sm:$0xff]   ;;  %v2403_v14 = vld [vmem:[#allocation2 + $0x60] ss:$12 sps:$4 sm:$0xff]  }
  0x21   :  { %v2401_v13 = vld [vmem:[#allocation2 + $0x1e4] ss:$12 sps:$4 sm:$0xff]   ;;  %v2404_v15 = vld [vmem:[#allocation2 + $0x1e0] ss:$12 sps:$4 sm:$0xff]   ;;  %v2409_v18 = vld [vmem:[#allocation2 + $0x48] ss:$12 sps:$4 sm:$0xff]  }
  0x22   :  { %1403 = vmatpush1.bf16.msra.mxu0 %v2391_v6  ;;  %v2405_v16 = vld [vmem:[#allocation2 + $0x4c] ss:$12 sps:$4 sm:$0xff]   ;;  %v2410_v19 = vld [vmem:[#allocation2 + $0x1c8] ss:$12 sps:$4 sm:$0xff]   ;;  %v2415_v22 = vld [vmem:[#allocation2 + $0x30] ss:$12 sps:$4 sm:$0xff]  }
  0x23   :  { %1444 = vmatpush1.bf16.msra.mxu1 %v2392_v7  ;;  %1404 = vmatprep.subr.bf16.mxu0 %v2393_v8  ;;  %v2407_v17 = vld [vmem:[#allocation2 + $0x1cc] ss:$12 sps:$4 sm:$0xff]   ;;  %v2411_v20 = vld [vmem:[#allocation2 + $0x34] ss:$12 sps:$4 sm:$0xff]   ;;  %v2416_v23 = vld [vmem:[#allocation2 + $0x1b0] ss:$12 sps:$4 sm:$0xff]  }
  0x24   :  { %1445 = vmatprep.subr.bf16.mxu1 %v2395_v9  ;;  %v2413_v21 = vld [vmem:[#allocation2 + $0x1b4] ss:$12 sps:$4 sm:$0xff]   ;;  %v2417_v24 = vld [vmem:[#allocation2 + $0x1c] ss:$12 sps:$4 sm:$0xff]   ;;  %v2421_v26 = vld [vmem:[#allocation2 + $0x18] ss:$12 sps:$4 sm:$0xff]  }
  0x25   :  { %v2419_v25 = vld [vmem:[#allocation2 + $0x19c] ss:$12 sps:$4 sm:$0xff]   ;;  %v2422_v27 = vld [vmem:[#allocation2 + $0x198] ss:$12 sps:$4 sm:$0xff]   ;;  %v2427_v30 = vld [vmem:[#allocation2] ss:$12 sps:$4 sm:$0xff]  }
  0x26   :  { %1405 = vmatpush1.bf16.msra.mxu0 %v2397_v10  ;;  %v2423_v28 = vld [vmem:[#allocation2 + $0x4] ss:$12 sps:$4 sm:$0xff]   ;;  %v2428_v31 = vld [vmem:[#allocation2 + $0x180] ss:$12 sps:$4 sm:$0xff]   ;;  %v2433_v34 = vld [vmem:[#allocation2 + $0x168] ss:$12 sps:$4 sm:$0xff]  }
  0x27   :  { %1446 = vmatpush1.bf16.msra.mxu1 %v2398_v11  ;;  %1406 = vmatprep.subr.bf16.mxu0 %v2399_v12  ;;  %v2425_v29 = vld [vmem:[#allocation2 + $0x184] ss:$12 sps:$4 sm:$0xff]   ;;  %v2429_v32 = vld [vmem:[#allocation2 + $0x16c] ss:$12 sps:$4 sm:$0xff]   ;;  %v2434_v35 = vld [vmem:[#allocation2 + $0x2e8] ss:$12 sps:$4 sm:$0xff]  }
  0x28   :  { %1447 = vmatprep.subr.bf16.mxu1 %v2401_v13  ;;  %v2431_v33 = vld [vmem:[#allocation2 + $0x2ec] ss:$12 sps:$4 sm:$0xff]   ;;  %v2713_v36 = vmov 1983009808   ;;  %v2435_v39 = vld [vmem:[#allocation2 + $0x154] ss:$12 sps:$4 sm:$0xff]  }
  0x29   :  { %v55_v37 = vunpack.c.l.s4 %v2713_v36  ;;  %v2437_v40 = vld [vmem:[#allocation2 + $0x2d4] ss:$12 sps:$4 sm:$0xff]   ;;  %v2439_v41 = vld [vmem:[#allocation2 + $0x150] ss:$12 sps:$4 sm:$0xff]   ;;  %v2752_v43 = vshrl.u32 %v57_v38, 7  ;;  %vm2715_vm0 = vmmov 0  }
  0x2a   :  { %1407 = vmatpush1.bf16.msra.mxu0 %v2403_v14  ;;  %v2440_v44 = vld [vmem:[#allocation2 + $0x2d0] ss:$12 sps:$4 sm:$0xff]   ;;  %v2445_v47 = vld [vmem:[#allocation2 + $0x138] ss:$12 sps:$4 sm:$0xff]   ;;  %v2451_v53 = vld [vmem:[#allocation2 + $0x120] ss:$12 sps:$4 sm:$0xff]  }
  0x2b   :  { %1448 = vmatpush1.bf16.msra.mxu1 %v2404_v15  ;;  %1408 = vmatprep.subr.bf16.mxu0 %v2405_v16  ;;  %v56_v42 = vunpack.c.0.s8 %v55_v37  ;;  %v2441_v45 = vld [vmem:[#allocation2 + $0x13c] ss:$12 sps:$4 sm:$0xff]   ;;  %v2446_v48 = vld [vmem:[#allocation2 + $0x2b8] ss:$12 sps:$4 sm:$0xff]   ;;  %v2452_v56 = vld [vmem:[#allocation2 + $0x2a0] ss:$12 sps:$4 sm:$0xff]  }
  0x2c   :  { %1449 = vmatprep.subr.bf16.mxu1 %v2407_v17  ;;  %v2443_v46 = vld [vmem:[#allocation2 + $0x2bc] ss:$12 sps:$4 sm:$0xff]   ;;  %v2447_v50 = vld [vmem:[#allocation2 + $0x124] ss:$12 sps:$4 sm:$0xff]   ;;  %v2453_v57 = vld [vmem:[#allocation2 + $0x10c] ss:$12 sps:$4 sm:$0xff]  }
  0x2d   :  { %v2755_v49 = vsub.s32 %v56_v42, %v2752_v43  ;;  %v2449_v51 = vld [vmem:[#allocation2 + $0x2a4] ss:$12 sps:$4 sm:$0xff]   ;;  %v2455_v58 = vld [vmem:[#allocation2 + $0x28c] ss:$12 sps:$4 sm:$0xff]   ;;  %v2457_v61 = vld [vmem:[#allocation2 + $0x108] ss:$12 sps:$4 sm:$0xff]  }
  0x2e   :  { %1409 = vmatpush1.bf16.msra.mxu0 %v2409_v18  ;;  %v49_v52 = vld [vmem:[%s2823_s0] sm:$0xff]  ;;  %v2458_v0 = vld [vmem:[#allocation2 + $0x288] ss:$12 sps:$4 sm:$0xff]   ;;  %v2463_v4 = vld [vmem:[#allocation2 + $0xf0] ss:$12 sps:$4 sm:$0xff]  }
  0x2f   :  { %1450 = vmatpush1.bf16.msra.mxu1 %v2410_v19  ;;  %1410 = vmatprep.subr.bf16.mxu0 %v2411_v20  ;;  %v60_v54 = vrot.slane %v49_v52, %v2755_v49  ;;  %v53_v55 = vcombine.high %v49_v52, %v49_v52  ;;  %v2459_v1 = vld [vmem:[#allocation2 + $0xf4] ss:$12 sps:$4 sm:$0xff]   ;;  %v2464_v5 = vld [vmem:[#allocation2 + $0x270] ss:$12 sps:$4 sm:$0xff]   ;;  %v2469_v8 = vld [vmem:[#allocation2 + $0xd8] ss:$12 sps:$4 sm:$0xff]  }
  0x30   :  { %1451 = vmatprep.subr.bf16.mxu1 %v2413_v21  ;;  %v2461_v2 = vld [vmem:[#allocation2 + $0x274] ss:$12 sps:$4 sm:$0xff]   ;;  %v2465_v6 = vld [vmem:[#allocation2 + $0xdc] ss:$12 sps:$4 sm:$0xff]   ;;  %v2470_v9 = vld [vmem:[#allocation2 + $0x258] ss:$12 sps:$4 sm:$0xff]  }
  0x31   :  { %v68_v59 = vcombine.high %v60_v54, %v60_v54  ;;  %v67_v60 = vrot.slane %v53_v55, %v2755_v49  ;;  %v2467_v7 = vld [vmem:[#allocation2 + $0x25c] ss:$12 sps:$4 sm:$0xff]   ;;  %v2471_v10 = vld [vmem:[#allocation2 + $0xc4] ss:$12 sps:$4 sm:$0xff]   ;;  %v2475_v12 = vld [vmem:[#allocation2 + $0xc0] ss:$12 sps:$4 sm:$0xff]   ;;  %v2768_v16 = vpack.c.bf16 %v60_v54, %v60_v54 }
  0x32   :  { %1411 = vmatpush1.bf16.msra.mxu0 %v2415_v22  ;;  %v2473_v11 = vld [vmem:[#allocation2 + $0x244] ss:$12 sps:$4 sm:$0xff]   ;;  %v2476_v13 = vld [vmem:[#allocation2 + $0x240] ss:$12 sps:$4 sm:$0xff]   ;;  %v2478_v18 = vld [vmem:[#allocation2 + $0x3a8] ss:$12 sps:$4 sm:$0xff]  }
  0x33   :  { %1452 = vmatpush1.bf16.msra.mxu1 %v2416_v23  ;;  %1412 = vmatprep.subr.bf16.mxu0 %v2417_v24  ;;  %v2762_v62 = vpack.c.bf16 %v68_v59, %v68_v59  ;;  %v69_v63 = vcombine.high %v67_v60, %v67_v60  ;;  %v2480_v14 = vld [vmem:[#allocation2 + $0x3ac] ss:$12 sps:$4 sm:$0xff]   ;;  %v2770_v17 = vpack.c.bf16 %v67_v60, %v67_v60  ;;  %v2481_v19 = vld [vmem:[#allocation2 + $0x528] ss:$12 sps:$4 sm:$0xff]   ;;  %v2484_v22 = vld [vmem:[#allocation2 + $0x390] ss:$12 sps:$4 sm:$0xff]  }
  0x34   :  { %1453 = vmatprep.subr.bf16.mxu1 %v2419_v25  ;;  %v2483_v15 = vld [vmem:[#allocation2 + $0x52c] ss:$12 sps:$4 sm:$0xff]   ;;  %v2486_v20 = vld [vmem:[#allocation2 + $0x394] ss:$12 sps:$4 sm:$0xff]   ;;  %v2487_v23 = vld [vmem:[#allocation2 + $0x510] ss:$12 sps:$4 sm:$0xff]  }
  0x35   :  { %v2764_v3 = vpack.c.bf16 %v69_v63, %v69_v63  ;;  %1432 = vmatprep.mubr.bf16.mxu0 %v2762_v62  ;;  %v2489_v21 = vld [vmem:[#allocation2 + $0x514] ss:$12 sps:$4 sm:$0xff]   ;;  %v2492_v24 = vld [vmem:[#allocation2 + $0x37c] ss:$12 sps:$4 sm:$0xff]   ;;  %v2525_v52 = vld [vmem:[#allocation2 + $0x484] ss:$12 sps:$4 sm:$0xff]  }
  0x36   :  { %1413 = vmatpush1.bf16.msra.mxu0 %v2421_v26  ;;  %v2495_v25 = vld [vmem:[#allocation2 + $0x4fc] ss:$12 sps:$4 sm:$0xff]   ;;  %v2490_v26 = vld [vmem:[#allocation2 + $0x378] ss:$12 sps:$4 sm:$0xff]   ;;  %v2510_v36 = vld [vmem:[#allocation2 + $0x334] ss:$12 sps:$4 sm:$0xff]  }
  0x37   :  { %1454 = vmatpush1.bf16.msra.mxu1 %v2422_v27  ;;  %1414 = vmatprep.subr.bf16.mxu0 %v2423_v28  ;;  %v2493_v27 = vld [vmem:[#allocation2 + $0x4f8] ss:$12 sps:$4 sm:$0xff]   ;;  %v2513_v37 = vld [vmem:[#allocation2 + $0x4b4] ss:$12 sps:$4 sm:$0xff]   ;;  %v2508_v38 = vld [vmem:[#allocation2 + $0x330] ss:$12 sps:$4 sm:$0xff]  }
  0x38   :  { %1455 = vmatprep.subr.bf16.mxu1 %v2425_v29  ;;  %1473 = vmatprep.mubr.bf16.mxu1 %v2764_v3  ;;  %v2498_v28 = vld [vmem:[#allocation2 + $0x364] ss:$12 sps:$4 sm:$0xff]   ;;  %v50_v42 = vld [vmem:[%s2823_s0 + $0x8] sm:$0xff]  ;;  %v2537_v63 = vld [vmem:[#allocation2 + $0x5d4] ss:$12 sps:$4 sm:$0xff]  }
  0x39   :  { %v2501_v29 = vld [vmem:[#allocation2 + $0x4e4] ss:$12 sps:$4 sm:$0xff]   ;;  %v2531_v59 = vld [vmem:[#allocation2 + $0x5ec] ss:$12 sps:$4 sm:$0xff]   ;;  %v2529_v60 = vld [vmem:[#allocation2 + $0x5e8] ss:$12 sps:$4 sm:$0xff]  }
  0x3a   :  { %1415 = vmatpush1.bf16.msra.mxu0 %v2427_v30  ;;  %v2496_v30 = vld [vmem:[#allocation2 + $0x360] ss:$12 sps:$4 sm:$0xff]  }
  0x3b   :  { %1456 = vmatpush1.bf16.msra.mxu1 %v2428_v31  ;;  %1416 = vmatprep.subr.bf16.mxu0 %v2429_v32  ;;  %v2499_v31 = vld [vmem:[#allocation2 + $0x4e0] ss:$12 sps:$4 sm:$0xff]  }
  0x3c   :  { %1457 = vmatprep.subr.bf16.mxu1 %v2431_v33  ;;  %v2504_v32 = vld [vmem:[#allocation2 + $0x34c] ss:$12 sps:$4 sm:$0xff]  }
  0x3d   :  { %v2507_v33 = vld [vmem:[#allocation2 + $0x4cc] ss:$12 sps:$4 sm:$0xff]  }
  0x3e   :  { %1417 = vmatpush2.bf16.msra.mxu0 %v2433_v34  ;;  %v2502_v34 = vld [vmem:[#allocation2 + $0x348] ss:$12 sps:$4 sm:$0xff]  }
  0x3f   :  { %1458 = vmatpush2.bf16.msra.mxu1 %v2434_v35  ;;  %1418 = vmatprep.subr.bf16.mxu0 %v2435_v39  ;;  %v2505_v35 = vld [vmem:[#allocation2 + $0x4c8] ss:$12 sps:$4 sm:$0xff]   ;;  %v2511_v39 = vld [vmem:[#allocation2 + $0x4b0] ss:$12 sps:$4 sm:$0xff]  }
  0x40   :  { %1459 = vmatprep.subr.bf16.mxu1 %v2437_v40  ;;  %v2516_v40 = vld [vmem:[#allocation2 + $0x31c] ss:$12 sps:$4 sm:$0xff]  }
  0x42   :  { %1419 = vmatpush2.bf16.msra.mxu0 %v2439_v41  ;;  %v2519_v41 = vld [vmem:[#allocation2 + $0x49c] ss:$12 sps:$4 sm:$0xff]  }
  0x43   :  { %1460 = vmatpush2.bf16.msra.mxu1 %v2440_v44  ;;  %1420 = vmatprep.subr.bf16.mxu0 %v2441_v45  ;;  %v2514_v44 = vld [vmem:[#allocation2 + $0x318] ss:$12 sps:$4 sm:$0xff]   ;;  %v2778_v45 = vrot.slane %v50_v42, %v2755_v49 }
  0x44   :  { %1461 = vmatprep.subr.bf16.mxu1 %v2443_v46  ;;  %v70_v46 = vcombine.high %v50_v42, %v50_v42  ;;  %v2586_v42 = vld [vmem:[#allocation2 + $0x200] ss:$12 sps:$4 sm:$0xff]  }
  0x46   :  { %1421 = vmatpush2.bf16.msra.mxu0 %v2445_v47  ;;  %v2517_v47 = vld [vmem:[#allocation2 + $0x498] ss:$12 sps:$4 sm:$0xff]  }
  0x47   :  { %1462 = vmatpush2.bf16.msra.mxu1 %v2446_v48  ;;  %1422 = vmatprep.subr.bf16.mxu0 %v2447_v50  ;;  %v2522_v48 = vld [vmem:[#allocation2 + $0x304] ss:$12 sps:$4 sm:$0xff]   ;;  %v85_v50 = vcombine.high %v2778_v45, %v2778_v45 }
  0x48   :  { %1463 = vmatprep.subr.bf16.mxu1 %v2449_v51  ;;  %v2783_v51 = vrot.slane %v70_v46, %v2755_v49  ;;  %v2526_v49 = vld [vmem:[#allocation2 + $0x468] ss:$12 sps:$4 sm:$0xff]  }
  0x49   :  { %v2785_v54 = vpack.c.bf16 %v85_v50, %v85_v50  ;;  %v2589_v46 = vld [vmem:[#allocation2 + $0x68] ss:$12 sps:$4 sm:$0xff]   ;;  %v2592_v50 = vld [vmem:[#allocation2 + $0x290] ss:$12 sps:$4 sm:$0xff]  }
  0x4a   :  { %1423 = vmatpush2.bf16.msra.mxu0 %v2451_v53  ;;  %v2520_v53 = vld [vmem:[#allocation2 + $0x300] ss:$12 sps:$4 sm:$0xff]   ;;  %v86_v55 = vcombine.high %v2783_v51, %v2783_v51 }
  0x4b   :  { %1464 = vmatpush2.bf16.msra.mxu1 %v2452_v56  ;;  %1424 = vmatprep.subr.bf16.mxu0 %v2453_v57  ;;  %v2523_v56 = vld [vmem:[#allocation2 + $0x480] ss:$12 sps:$4 sm:$0xff]  }
  0x4c   :  { %1465 = vmatprep.subr.bf16.mxu1 %v2455_v58  ;;  %v2528_v57 = vld [vmem:[#allocation2 + $0x46c] ss:$12 sps:$4 sm:$0xff]   ;;  %v2789_v58 = vpack.c.bf16 %v86_v55, %v86_v55 }
  0x4d   :  { %v2598_v55 = vld [vmem:[#allocation2 + $0x1b8] ss:$12 sps:$4 sm:$0xff]  }
  0x4e   :  { %1425 = vmatpush2.bf16.msra.mxu0 %v2457_v61  ;;  %v2534_v61 = vld [vmem:[#allocation2 + $0x454] ss:$12 sps:$4 sm:$0xff]  }
  0x4f   :  { %1466 = vmatpush2.bf16.msra.mxu1 %v2458_v0  ;;  %1426 = vmatprep.subr.bf16.mxu0 %v2459_v1  ;;  %v2532_v0 = vld [vmem:[#allocation2 + $0x450] ss:$12 sps:$4 sm:$0xff]  }
  0x50   :  { %1467 = vmatprep.subr.bf16.mxu1 %v2461_v2  ;;  %v2535_v1 = vld [vmem:[#allocation2 + $0x5d0] ss:$12 sps:$4 sm:$0xff]  }
  0x51   :  { %v2540_v2 = vld [vmem:[#allocation2 + $0x43c] ss:$12 sps:$4 sm:$0xff]  }
  0x52   :  { %1427 = vmatpush2.bf16.msra.mxu0 %v2463_v4  ;;  %v2543_v4 = vld [vmem:[#allocation2 + $0x5bc] ss:$12 sps:$4 sm:$0xff]  }
  0x53   :  { %1468 = vmatpush2.bf16.msra.mxu1 %v2464_v5  ;;  %1428 = vmatprep.subr.bf16.mxu0 %v2465_v6  ;;  %v2538_v5 = vld [vmem:[#allocation2 + $0x438] ss:$12 sps:$4 sm:$0xff]  }
  0x54   :  { %1469 = vmatprep.subr.bf16.mxu1 %v2467_v7  ;;  %v2541_v6 = vld [vmem:[#allocation2 + $0x5b8] ss:$12 sps:$4 sm:$0xff]  }
  0x55   :  { %v2546_v7 = vld [vmem:[#allocation2 + $0x424] ss:$12 sps:$4 sm:$0xff]  }
  0x56   :  { %1429 = vmatpush2.bf16.msra.mxu0 %v2469_v8  ;;  %v2549_v8 = vld [vmem:[#allocation2 + $0x5a4] ss:$12 sps:$4 sm:$0xff]  }
  0x57   :  { %1470 = vmatpush2.bf16.msra.mxu1 %v2470_v9  ;;  %1430 = vmatprep.subr.bf16.mxu0 %v2471_v10  ;;  %v2544_v9 = vld [vmem:[#allocation2 + $0x420] ss:$12 sps:$4 sm:$0xff]  }
  0x58   :  { %1471 = vmatprep.subr.bf16.mxu1 %v2473_v11  ;;  %v2547_v10 = vld [vmem:[#allocation2 + $0x5a0] ss:$12 sps:$4 sm:$0xff]  }
  0x59   :  { %v2552_v11 = vld [vmem:[#allocation2 + $0x40c] ss:$12 sps:$4 sm:$0xff]  }
  0x5a   :  { %1431 = vmatpush2.bf16.msra.mxu0 %v2475_v12  ;;  %v2555_v12 = vld [vmem:[#allocation2 + $0x58c] ss:$12 sps:$4 sm:$0xff]  }
  0x5b   :  { %1472 = vmatpush2.bf16.msra.mxu1 %v2476_v13  ;;  %1482 = vmatprep.subr.bf16.mxu0 %v2480_v14  ;;  %v2550_v13 = vld [vmem:[#allocation2 + $0x408] ss:$12 sps:$4 sm:$0xff]  }
  0x5c   :  { %1523 = vmatprep.subr.bf16.mxu1 %v2483_v15  ;;  %v2553_v14 = vld [vmem:[#allocation2 + $0x588] ss:$12 sps:$4 sm:$0xff]  }
  0x5d   :  { %1433 = vmatmul.mubr.bf16.vlgmr.msra.gmra.mxu0 %v2768_v16  ;;  %v2558_v15 = vld [vmem:[#allocation2 + $0x3f4] ss:$12 sps:$4 sm:$0xff]  }
  0x5e   :  { %1474 = vmatmul.mubr.bf16.vlgmr.msra.gmra.mxu1 %v2770_v17  ;;  %1483 = vmatpush1.bf16.msra.mxu0 %v2478_v18  ;;  %v2561_v18 = vld [vmem:[#allocation2 + $0x574] ss:$12 sps:$4 sm:$0xff]  }
  0x5f   :  { %1524 = vmatpush1.bf16.msra.mxu1 %v2481_v19  ;;  %1484 = vmatprep.subr.bf16.mxu0 %v2486_v20  ;;  %v2556_v19 = vld [vmem:[#allocation2 + $0x3f0] ss:$12 sps:$4 sm:$0xff]  }
  0x60   :  { %1525 = vmatprep.subr.bf16.mxu1 %v2489_v21  ;;  %1514 = vmatprep.mubr.bf16.mxu0 %v2785_v54  ;;  %v2559_v20 = vld [vmem:[#allocation2 + $0x570] ss:$12 sps:$4 sm:$0xff]  }
  0x61   :  { %1555 = vmatprep.mubr.bf16.mxu1 %v2789_v58  ;;  %v2564_v21 = vld [vmem:[#allocation2 + $0x3dc] ss:$12 sps:$4 sm:$0xff]  }
  0x62   :  { %1485 = vmatpush1.bf16.msra.mxu0 %v2484_v22  ;;  %v2567_v22 = vld [vmem:[#allocation2 + $0x55c] ss:$12 sps:$4 sm:$0xff]  }
  0x63   :  { %1526 = vmatpush1.bf16.msra.mxu1 %v2487_v23  ;;  %1486 = vmatprep.subr.bf16.mxu0 %v2492_v24  ;;  %v2562_v23 = vld [vmem:[#allocation2 + $0x3d8] ss:$12 sps:$4 sm:$0xff]  }
  0x64   :  { %1527 = vmatprep.subr.bf16.mxu1 %v2495_v25  ;;  %v2565_v24 = vld [vmem:[#allocation2 + $0x558] ss:$12 sps:$4 sm:$0xff]  }
  0x65   :  { %v2570_v25 = vld [vmem:[#allocation2 + $0x3c4] ss:$12 sps:$4 sm:$0xff]  }
  0x66   :  { %1487 = vmatpush1.bf16.msra.mxu0 %v2490_v26  ;;  %v2573_v26 = vld [vmem:[#allocation2 + $0x544] ss:$12 sps:$4 sm:$0xff]  }
  0x67   :  { %1528 = vmatpush1.bf16.msra.mxu1 %v2493_v27  ;;  %1488 = vmatprep.subr.bf16.mxu0 %v2498_v28  ;;  %v2568_v27 = vld [vmem:[#allocation2 + $0x3c0] ss:$12 sps:$4 sm:$0xff]  }
  0x68   :  { %1529 = vmatprep.subr.bf16.mxu1 %v2501_v29  ;;  %v2571_v28 = vld [vmem:[#allocation2 + $0x540] ss:$12 sps:$4 sm:$0xff]   ;;  %v2575_v29 = vld [vmem:[#allocation2 + $0x170] ss:$12 sps:$4 sm:$0xff]  }
  0x6a   :  { %1489 = vmatpush1.bf16.msra.mxu0 %v2496_v30  ;;  %v2576_v30 = vld [vmem:[#allocation2 + $0x2f0] ss:$12 sps:$4 sm:$0xff]  }
  0x6b   :  { %1530 = vmatpush1.bf16.msra.mxu1 %v2499_v31  ;;  %1490 = vmatprep.subr.bf16.mxu0 %v2504_v32  ;;  %v2577_v31 = vld [vmem:[#allocation2 + $0xb0] ss:$12 sps:$4 sm:$0xff]   ;;  %v2795_v32 = vpack.c.bf16 %v2778_v45, %v2778_v45  ;;  %v2588_v45 = vld [vmem:[#allocation2 + $0x2a8] ss:$12 sps:$4 sm:$0xff]  }
  0x6c   :  { %1531 = vmatprep.subr.bf16.mxu1 %v2507_v33  ;;  %v2799_v33 = vpack.c.bf16 %v2783_v51, %v2783_v51  ;;  %v2593_v51 = vld [vmem:[#allocation2 + $0x50] ss:$12 sps:$4 sm:$0xff]  }
  0x6e   :  { %1491 = vmatpush1.bf16.msra.mxu0 %v2502_v34  ;;  %v2578_v34 = vld [vmem:[#allocation2 + $0x230] ss:$12 sps:$4 sm:$0xff]  }
  0x6f   :  { %1532 = vmatpush1.bf16.msra.mxu1 %v2505_v35  ;;  %1492 = vmatprep.subr.bf16.mxu0 %v2510_v36  ;;  %v2579_v35 = vld [vmem:[#allocation2 + $0x158] ss:$12 sps:$4 sm:$0xff]  }
  0x70   :  { %1533 = vmatprep.subr.bf16.mxu1 %v2513_v37  ;;  %v2580_v36 = vld [vmem:[#allocation2 + $0x2d8] ss:$12 sps:$4 sm:$0xff]  }
  0x71   :  { %v2581_v37 = vld [vmem:[#allocation2 + $0x98] ss:$12 sps:$4 sm:$0xff]  }
  0x72   :  { %1493 = vmatpush1.bf16.msra.mxu0 %v2508_v38  ;;  %v2582_v38 = vld [vmem:[#allocation2 + $0x218] ss:$12 sps:$4 sm:$0xff]  }
  0x73   :  { %1534 = vmatpush1.bf16.msra.mxu1 %v2511_v39  ;;  %1494 = vmatprep.subr.bf16.mxu0 %v2516_v40  ;;  %v2583_v39 = vld [vmem:[#allocation2 + $0x140] ss:$12 sps:$4 sm:$0xff]  }
  0x74   :  { %1535 = vmatprep.subr.bf16.mxu1 %v2519_v41  ;;  %v2584_v40 = vld [vmem:[#allocation2 + $0x2c0] ss:$12 sps:$4 sm:$0xff]  }
  0x75   :  { %v2585_v41 = vld [vmem:[#allocation2 + $0x80] ss:$12 sps:$4 sm:$0xff]  }
  0x76   :  { %1495 = vmatpush1.bf16.msra.mxu0 %v2514_v44  ;;  %v2587_v44 = vld [vmem:[#allocation2 + $0x128] ss:$12 sps:$4 sm:$0xff]  }
  0x77   :  { %1536 = vmatpush1.bf16.msra.mxu1 %v2517_v47  ;;  %1496 = vmatprep.subr.bf16.mxu0 %v2522_v48  ;;  %v2590_v47 = vld [vmem:[#allocation2 + $0x1e8] ss:$12 sps:$4 sm:$0xff]   ;;  %v2591_v48 = vld [vmem:[#allocation2 + $0x110] ss:$12 sps:$4 sm:$0xff]  }
  0x78   :  { %1537 = vmatprep.subr.bf16.mxu1 %v2525_v52  ;;  %v2594_v52 = vld [vmem:[#allocation2 + $0x1d0] ss:$12 sps:$4 sm:$0xff]  }
  0x7a   :  { %1497 = vmatpush1.bf16.msra.mxu0 %v2520_v53  ;;  %v2597_v53 = vld [vmem:[#allocation2 + $0x38] ss:$12 sps:$4 sm:$0xff]  }
  0x7b   :  { %1538 = vmatpush1.bf16.msra.mxu1 %v2523_v56  ;;  %1498 = vmatprep.subr.bf16.mxu0 %v2528_v57  ;;  %v2599_v56 = vld [vmem:[#allocation2 + $0xe0] ss:$12 sps:$4 sm:$0xff]  }
  0x7c   :  { %1539 = vmatprep.subr.bf16.mxu1 %v2531_v59  ;;  %v2600_v57 = vld [vmem:[#allocation2 + $0x260] ss:$12 sps:$4 sm:$0xff]  }
  0x7d   :  { %v2601_v59 = vld [vmem:[#allocation2 + $0x20] ss:$12 sps:$4 sm:$0xff]  }
  0x7e   :  { %1499 = vmatpush2.bf16.msra.mxu0 %v2526_v49  ;;  %v2602_v49 = vld [vmem:[#allocation2 + $0x1a0] ss:$12 sps:$4 sm:$0xff]  }
  0x7f   :  { %1540 = vmatpush2.bf16.msra.mxu1 %v2529_v60  ;;  %1500 = vmatprep.subr.bf16.mxu0 %v2534_v61  ;;  %v2603_v60 = vld [vmem:[#allocation2 + $0xc8] ss:$12 sps:$4 sm:$0xff]  }
  0x80   :  { %1541 = vmatprep.subr.bf16.mxu1 %v2537_v63  ;;  %v2604_v61 = vld [vmem:[#allocation2 + $0x248] ss:$12 sps:$4 sm:$0xff]  }
  0x81   :  { %v2605_v63 = vld [vmem:[#allocation2 + $0x8] ss:$12 sps:$4 sm:$0xff]  }
  0x82   :  { %1501 = vmatpush2.bf16.msra.mxu0 %v2532_v0  ;;  %v2606_v0 = vld [vmem:[#allocation2 + $0x188] ss:$12 sps:$4 sm:$0xff]  }
  0x83   :  { %1542 = vmatpush2.bf16.msra.mxu1 %v2535_v1  ;;  %1502 = vmatprep.subr.bf16.mxu0 %v2540_v2  ;;  %v2607_v1 = vld [vmem:[#allocation2 + $0x470] ss:$12 sps:$4 sm:$0xff]  }
  0x84   :  { %1543 = vmatprep.subr.bf16.mxu1 %v2543_v4  ;;  %v2608_v2 = vld [vmem:[#allocation2 + $0x5f0] ss:$12 sps:$4 sm:$0xff]  }
  0x85   :  { %v2609_v4 = vld [vmem:[#allocation2 + $0x3b0] ss:$12 sps:$4 sm:$0xff]  }
  0x86   :  { %1503 = vmatpush2.bf16.msra.mxu0 %v2538_v5  ;;  %v2610_v5 = vld [vmem:[#allocation2 + $0x530] ss:$12 sps:$4 sm:$0xff]  }
  0x87   :  { %1544 = vmatpush2.bf16.msra.mxu1 %v2541_v6  ;;  %1504 = vmatprep.subr.bf16.mxu0 %v2546_v7  ;;  %v2611_v6 = vld [vmem:[#allocation2 + $0x458] ss:$12 sps:$4 sm:$0xff]  }
  0x88   :  { %1545 = vmatprep.subr.bf16.mxu1 %v2549_v8  ;;  %v2612_v7 = vld [vmem:[#allocation2 + $0x5d8] ss:$12 sps:$4 sm:$0xff]  }
  0x89   :  { %v2613_v8 = vld [vmem:[#allocation2 + $0x398] ss:$12 sps:$4 sm:$0xff]  }
  0x8a   :  { %1505 = vmatpush2.bf16.msra.mxu0 %v2544_v9  ;;  %v2614_v9 = vld [vmem:[#allocation2 + $0x518] ss:$12 sps:$4 sm:$0xff]  }
  0x8b   :  { %1546 = vmatpush2.bf16.msra.mxu1 %v2547_v10  ;;  %1506 = vmatprep.subr.bf16.mxu0 %v2552_v11  ;;  %v2615_v10 = vld [vmem:[#allocation2 + $0x440] ss:$12 sps:$4 sm:$0xff]  }
  0x8c   :  { %1547 = vmatprep.subr.bf16.mxu1 %v2555_v12  ;;  %v2616_v11 = vld [vmem:[#allocation2 + $0x5c0] ss:$12 sps:$4 sm:$0xff]  }
  0x8d   :  { %v2617_v12 = vld [vmem:[#allocation2 + $0x380] ss:$12 sps:$4 sm:$0xff]  }
  0x8e   :  { %1507 = vmatpush2.bf16.msra.mxu0 %v2550_v13  ;;  %v2618_v13 = vld [vmem:[#allocation2 + $0x500] ss:$12 sps:$4 sm:$0xff]  }
  0x8f   :  { %1548 = vmatpush2.bf16.msra.mxu1 %v2553_v14  ;;  %1508 = vmatprep.subr.bf16.mxu0 %v2558_v15  ;;  %v2619_v14 = vld [vmem:[#allocation2 + $0x428] ss:$12 sps:$4 sm:$0xff]  }
  0x90   :  { %1549 = vmatprep.subr.bf16.mxu1 %v2561_v18  ;;  %v2622_v15 = vld [vmem:[#allocation2 + $0x4e8] ss:$12 sps:$4 sm:$0xff]   ;;  %v2623_v18 = vld [vmem:[#allocation2 + $0x410] ss:$12 sps:$4 sm:$0xff]  }
  0x92   :  { %1509 = vmatpush2.bf16.msra.mxu0 %v2556_v19  ;;  %v2624_v19 = vld [vmem:[#allocation2 + $0x590] ss:$12 sps:$4 sm:$0xff]  }
  0x93   :  { %1550 = vmatpush2.bf16.msra.mxu1 %v2559_v20  ;;  %1510 = vmatprep.subr.bf16.mxu0 %v2564_v21  ;;  %v2625_v20 = vld [vmem:[#allocation2 + $0x350] ss:$12 sps:$4 sm:$0xff]   ;;  %v2628_v21 = vld [vmem:[#allocation2 + $0x578] ss:$12 sps:$4 sm:$0xff]  }
  0x94   :  { %1551 = vmatprep.subr.bf16.mxu1 %v2567_v22  ;;  %v2629_v22 = vld [vmem:[#allocation2 + $0x338] ss:$12 sps:$4 sm:$0xff]  }
  0x96   :  { %1511 = vmatpush2.bf16.msra.mxu0 %v2562_v23  ;;  %v2630_v23 = vld [vmem:[#allocation2 + $0x4b8] ss:$12 sps:$4 sm:$0xff]  }
  0x97   :  { %1552 = vmatpush2.bf16.msra.mxu1 %v2565_v24  ;;  %1512 = vmatprep.subr.bf16.mxu0 %v2570_v25  ;;  %v2631_v24 = vld [vmem:[#allocation2 + $0x3e0] ss:$12 sps:$4 sm:$0xff]  }
  0x98   :  { %1553 = vmatprep.subr.bf16.mxu1 %v2573_v26  ;;  %v2632_v25 = vld [vmem:[#allocation2 + $0x560] ss:$12 sps:$4 sm:$0xff]  }
  0x99   :  { %v2633_v26 = vld [vmem:[#allocation2 + $0x320] ss:$12 sps:$4 sm:$0xff]  }
  0x9a   :  { %1513 = vmatpush2.bf16.msra.mxu0 %v2568_v27  ;;  %v2634_v27 = vld [vmem:[#allocation2 + $0x4a0] ss:$12 sps:$4 sm:$0xff]  }
  0x9b   :  { %1554 = vmatpush2.bf16.msra.mxu1 %v2571_v28  ;;  %2233 = vmatprep.subr.bf16.mxu0 %v2575_v29  ;;  %v2635_v28 = vld [vmem:[#allocation2 + $0x3c8] ss:$12 sps:$4 sm:$0xff]  }
  0x9c   :  { %2255 = vmatprep.subr.bf16.mxu1 %v2576_v30  ;;  %v2636_v29 = vld [vmem:[#allocation2 + $0x548] ss:$12 sps:$4 sm:$0xff]  }
  0x9d   :  { %1515 = vmatmul.mubr.bf16.vlgmr.msra.gmra.mxu0 %v2795_v32  ;;  %v2637_v30 = vld [vmem:[#allocation2 + $0x308] ss:$12 sps:$4 sm:$0xff]  }
  0x9e   :  { %1556 = vmatmul.mubr.bf16.vlgmr.msra.gmra.mxu1 %v2799_v33  ;;  %2234 = vmatpush3.bf16.msra.mxu0 %v2577_v31  ;;  %v2638_v31 = vld [vmem:[#allocation2 + $0x488] ss:$12 sps:$4 sm:$0xff]  }
  0x9f   :  { %2256 = vmatpush3.bf16.msra.mxu1 %v2578_v34  ;;  %2235 = vmatprep.subr.bf16.mxu0 %v2579_v35  ;;  %v2639_v34 = vld [vmem:[#allocation4 + $0x78] sm:$0xff]  }
  0xa0   :  { %2257 = vmatprep.subr.bf16.mxu1 %v2580_v36  ;;  %1596 = vmatprep.mubr.bf16.mxu0 %v2762_v62  ;;  %v2595_v62 = vld [vmem:[#allocation2 + $0xf8] ss:$12 sps:$4 sm:$0xff]   ;;  %v2641_v36 = vld [vmem:[#allocation4 + $0x70] sm:$0xff]  }
  0xa1   :  { %1636 = vmatprep.mubr.bf16.mxu1 %v2764_v3  ;;  %v2596_v3 = vld [vmem:[#allocation2 + $0x278] ss:$12 sps:$4 sm:$0xff]  }
  0xa2   :  { %2236 = vmatpush3.bf16.msra.mxu0 %v2581_v37  ;;  %v2640_v35 = vld [vmem:[#allocation4 + $0x38] sm:$0xff]   ;;  %v2642_v37 = vld [vmem:[#allocation4 + $0x30] sm:$0xff]  }
  0xa3   :  { %2258 = vmatpush3.bf16.msra.mxu1 %v2582_v38  ;;  %2237 = vmatprep.subr.bf16.mxu0 %v2583_v39  ;;  %v2643_v38 = vld [vmem:[#allocation4 + $0x68] sm:$0xff]  }
  0xa4   :  { %2259 = vmatprep.subr.bf16.mxu1 %v2584_v40  ;;  %v2644_v39 = vld [vmem:[#allocation4 + $0x28] sm:$0xff]   ;;  %v2645_v40 = vld [vmem:[#allocation4 + $0x60] sm:$0xff]  }
  0xa6   :  { %2238 = vmatpush3.bf16.msra.mxu0 %v2585_v41  ;;  %v2646_v41 = vld [vmem:[#allocation4 + $0x20] sm:$0xff]  }
  0xa7   :  { %2260 = vmatpush3.bf16.msra.mxu1 %v2586_v42  ;;  %2239 = vmatprep.subr.bf16.mxu0 %v2587_v44  ;;  %v2647_v42 = vld [vmem:[#allocation4 + $0x58] sm:$0xff]  }
  0xa8   :  { %2261 = vmatprep.subr.bf16.mxu1 %v2588_v45  ;;  %v2648_v44 = vld [vmem:[#allocation4 + $0x18] sm:$0xff]   ;;  %v2649_v45 = vld [vmem:[#allocation4 + $0x50] sm:$0xff]  }
  0xaa   :  { %2240 = vmatpush3.bf16.msra.mxu0 %v2589_v46  ;;  %v2652_v46 = vld [vmem:[#allocation4 + $0x8] sm:$0xff]  }
  0xab   :  { %2262 = vmatpush3.bf16.msra.mxu1 %v2590_v47  ;;  %2241 = vmatprep.subr.bf16.mxu0 %v2591_v48  ;;  %v2653_v47 = vld [vmem:[#allocation4 + $0x40] sm:$0xff]  }
  0xac   :  { %2263 = vmatprep.subr.bf16.mxu1 %v2592_v50  ;;  %v2654_v48 = vld [vmem:[#allocation4] sm:$0xff]   ;;  %v2655_v50 = vld [vmem:[#allocation4 + $0xb8] sm:$0xff]  }
  0xae   :  { %2242 = vmatpush3.bf16.msra.mxu0 %v2593_v51  ;;  %v2714_v51 = vmov 0.0  }
  0xaf   :  { %2264 = vmatpush3.bf16.msra.mxu1 %v2594_v52  ;;  %2243 = vmatprep.subr.bf16.mxu0 %v2595_v62  ;;  %v2656_v52 = vld [vmem:[#allocation4 + $0xb0] sm:$0xff]   ;;  %v2657_v62 = vld [vmem:[#allocation4 + $0xa8] sm:$0xff]  }
  0xb0   :  { %2265 = vmatprep.subr.bf16.mxu1 %v2596_v3  ;;  %v2658_v3 = vld [vmem:[#allocation4 + $0xa0] sm:$0xff]  }
  0xb2   :  { %2244 = vmatpush3.bf16.msra.mxu0 %v2597_v53  ;;  %v2659_v53 = vld [vmem:[#allocation4 + $0x98] sm:$0xff]  }
  0xb3   :  { %2266 = vmatpush3.bf16.msra.mxu1 %v2598_v55  ;;  %2245 = vmatprep.subr.bf16.mxu0 %v2599_v56 }
  0xb4   :  { %2267 = vmatprep.subr.bf16.mxu1 %v2600_v57  ;;  %v2660_v57 = vld [vmem:[#allocation4 + $0x90] sm:$0xff]  }
  0xb6   :  { %2246 = vmatpush3.bf16.msra.mxu0 %v2601_v59 }
  0xb7   :  { %2268 = vmatpush3.bf16.msra.mxu1 %v2602_v49  ;;  %2247 = vmatprep.subr.bf16.mxu0 %v2603_v60 }
  0xb8   :  { %2269 = vmatprep.subr.bf16.mxu1 %v2604_v61 }
  0xba   :  { %2248 = vmatpush3.bf16.msra.mxu0 %v2605_v63  ;;  %v2661_v63 = vld [vmem:[#allocation4 + $0x88] sm:$0xff]  }
  0xbb   :  { %2270 = vmatpush3.bf16.msra.mxu1 %v2606_v0  ;;  %2277 = vmatprep.subr.bf16.mxu0 %v2607_v1 }
  0xbc   :  { %2299 = vmatprep.subr.bf16.mxu1 %v2608_v2  ;;  %v2662_v2 = vld [vmem:[#allocation4 + $0x80] sm:$0xff]  }
  0xbd   :  { %1597 = vmatmul.mubr.bf16.vlgmr.msra.gmra.mxu0 %v2768_v16  ;;  %v2620_v16 = vld [vmem:[#allocation2 + $0x5a8] ss:$12 sps:$4 sm:$0xff]  }
  0xbe   :  { %1637 = vmatmul.mubr.bf16.vlgmr.msra.gmra.mxu1 %v2770_v17  ;;  %2278 = vmatpush3.bf16.msra.mxu0 %v2609_v4  ;;  %v2621_v17 = vld [vmem:[#allocation2 + $0x368] ss:$12 sps:$4 sm:$0xff]   ;;  %v363_v4 = vsub.s32 0, %v2752_v43 }
  0xbf   :  { %2300 = vmatpush3.bf16.msra.mxu1 %v2610_v5  ;;  %2279 = vmatprep.subr.bf16.mxu0 %v2611_v6  ;;  %v359_v5 = vld [vmem:[%s2825_s2] sm:$0x7]  ;;  %v367_v6 = vsub.s32 1, %v2752_v43 }
  0xc0   :  { %2301 = vmatprep.subr.bf16.mxu1 %v2612_v7  ;;  %1676 = vmatprep.mubr.bf16.mxu0 %v2785_v54  ;;  %v2626_v54 = vld [vmem:[#allocation2 + $0x4d0] ss:$12 sps:$4 sm:$0xff]   ;;  %v364_v7 = vrot.slane %v359_v5, %v363_v4 }
  0xc1   :  { %1716 = vmatprep.mubr.bf16.mxu1 %v2789_v58  ;;  %v2627_v58 = vld [vmem:[#allocation2 + $0x3f8] ss:$12 sps:$4 sm:$0xff]  }
  0xc2   :  { %2280 = vmatpush3.bf16.msra.mxu0 %v2613_v8  ;;  %v368_v8 = vrot.slane %v359_v5, %v367_v6 }
  0xc3   :  { %2302 = vmatpush3.bf16.msra.mxu1 %v2614_v9  ;;  %2281 = vmatprep.subr.bf16.mxu0 %v2615_v10 }
  0xc4   :  { %2303 = vmatprep.subr.bf16.mxu1 %v2616_v11 }
  0xc6   :  { %2282 = vmatpush3.bf16.msra.mxu0 %v2617_v12 }
  0xc7   :  { %2304 = vmatpush3.bf16.msra.mxu1 %v2618_v13  ;;  %2283 = vmatprep.subr.bf16.mxu0 %v2619_v14 }
  0xc8   :  { %2305 = vmatprep.subr.bf16.mxu1 %v2620_v16 }
  0xca   :  { %2284 = vmatpush3.bf16.msra.mxu0 %v2621_v17 }
  0xcb   :  { %2306 = vmatpush3.bf16.msra.mxu1 %v2622_v15  ;;  %2285 = vmatprep.subr.bf16.mxu0 %v2623_v18 }
  0xcc   :  { %2307 = vmatprep.subr.bf16.mxu1 %v2624_v19 }
  0xce   :  { %2286 = vmatpush3.bf16.msra.mxu0 %v2625_v20 }
  0xcf   :  { %2308 = vmatpush3.bf16.msra.mxu1 %v2626_v54  ;;  %2287 = vmatprep.subr.bf16.mxu0 %v2627_v58 }
  0xd0   :  { %2309 = vmatprep.subr.bf16.mxu1 %v2628_v21 }
  0xd2   :  { %2288 = vmatpush3.bf16.msra.mxu0 %v2629_v22 }
  0xd3   :  { %2310 = vmatpush3.bf16.msra.mxu1 %v2630_v23  ;;  %2289 = vmatprep.subr.bf16.mxu0 %v2631_v24 }
  0xd4   :  { %2311 = vmatprep.subr.bf16.mxu1 %v2632_v25 }
  0xd6   :  { %2290 = vmatpush3.bf16.msra.mxu0 %v2633_v26 }
  0xd7   :  { %2312 = vmatpush3.bf16.msra.mxu1 %v2634_v27  ;;  %2291 = vmatprep.subr.bf16.mxu0 %v2635_v28 }
  0xd8   :  { %2313 = vmatprep.subr.bf16.mxu1 %v2636_v29 }
  0xda   :  { %2292 = vmatpush3.bf16.msra.mxu0 %v2637_v30 }
  0xdb   :  { %2314 = vmatpush3.bf16.msra.mxu1 %v2638_v31  ;;  %2321 = vmatprep.subr.bf16.mxu0 %v2639_v34 }
  0xdc   :  { %2352 = vmatprep.subr.bf16.mxu1 %v2714_v51 }
  0xdd   :  { %1677 = vmatmul.mubr.bf16.vlgmr.msra.gmra.mxu0 %v2795_v32  ;;  %v2650_v32 = vld [vmem:[#allocation4 + $0x10] sm:$0xff]  }
  0xde   :  { %1717 = vmatmul.mubr.bf16.vlgmr.msra.gmra.mxu1 %v2799_v33  ;;  %2322 = vmatpush3.bf16.msra.mxu0 %v2640_v35  ;;  %v2651_v33 = vld [vmem:[#allocation4 + $0x48] sm:$0xff]  }
  0xdf   :  { %2323 = vmatprep.subr.bf16.mxu0 %v2641_v36  ;;  %2353 = vmatpush3.bf16.msra.mxu1 %v2655_v50 }
  0xe0   :  { %2354 = vmatprep.subr.bf16.mxu1 %v2714_v51  ;;  %2368 = vmatprep.mubr.msk.bf16.mxu1 %vm2715_vm0, %v2714_v51 }
  0xe2   :  { %2324 = vmatpush3.bf16.msra.mxu0 %v2642_v37  ;;  %v371_v37 = vsub.s32 2, %v2752_v43 }
  0xe3   :  { %2325 = vmatprep.subr.bf16.mxu0 %v2643_v38  ;;  %2355 = vmatpush3.bf16.msra.mxu1 %v2656_v52 }
  0xe4   :  { %2356 = vmatprep.subr.bf16.mxu1 %v2714_v51  ;;  %v372_v38 = vrot.slane %v359_v5, %v371_v37 }
  0xe6   :  { %2326 = vmatpush3.bf16.msra.mxu0 %v2644_v39 }
  0xe7   :  { %2327 = vmatprep.subr.bf16.mxu0 %v2645_v40  ;;  %2357 = vmatpush3.bf16.msra.mxu1 %v2657_v62 }
  0xe8   :  { %2358 = vmatprep.subr.bf16.mxu1 %v2714_v51 }
  0xea   :  { %2328 = vmatpush3.bf16.msra.mxu0 %v2646_v41 }
  0xeb   :  { %2329 = vmatprep.subr.bf16.mxu0 %v2647_v42  ;;  %2359 = vmatpush3.bf16.msra.mxu1 %v2658_v3 }
  0xec   :  { %2360 = vmatprep.subr.bf16.mxu1 %v2714_v51 }
  0xee   :  { %2330 = vmatpush3.bf16.msra.mxu0 %v2648_v44 }
  0xef   :  { %2331 = vmatprep.subr.bf16.mxu0 %v2649_v45  ;;  %2361 = vmatpush3.bf16.msra.mxu1 %v2659_v53 }
  0xf0   :  { %2362 = vmatprep.subr.bf16.mxu1 %v2714_v51 }
  0xf2   :  { %2332 = vmatpush3.bf16.msra.mxu0 %v2650_v32 }
  0xf3   :  { %2333 = vmatprep.subr.bf16.mxu0 %v2651_v33  ;;  %2363 = vmatpush3.bf16.msra.mxu1 %v2660_v57 }
  0xf4   :  { %2364 = vmatprep.subr.bf16.mxu1 %v2714_v51 }
  0xf6   :  { %2334 = vmatpush3.bf16.msra.mxu0 %v2652_v46 }
  0xf7   :  { %2335 = vmatprep.subr.bf16.mxu0 %v2653_v47  ;;  %2365 = vmatpush3.bf16.msra.mxu1 %v2661_v63 }
  0xf8   :  { %2366 = vmatprep.subr.bf16.mxu1 %v2714_v51 }
  0xfa   :  { %2336 = vmatpush3.bf16.msra.mxu0 %v2654_v48 }
  0xfb   :  { %2367 = vmatpush3.bf16.msra.mxu1 %v2662_v2 }
 0x11d   :  { %v1434_v55 = vpop.f32.mrf.mxu0 }
 0x11e   :  { %v1475_v56 = vpop.f32.mrf.mxu1  ;;  %v1435_v9 = vadd.f32 %v1434_v55, %v364_v7 }
 0x11f   :  { %v1436_v59 = vpop.f32.mrf.mxu0 }
 0x120   :  { %v1477_v49 = vpop.f32.mrf.mxu1  ;;  %v1437_v10 = vadd.f32 %v1436_v59, %v368_v8  ;;  %v1476_v11 = vadd.f32 %v1475_v56, %v1435_v9 }
 0x121   :  { %v1438_v60 = vpop.f32.mrf.mxu0 }
 0x122   :  { %v1479_v61 = vpop.f32.mrf.mxu1  ;;  %v1478_v14 = vadd.f32 %v1477_v49, %v1437_v10  ;;  %v2208_v60 = vld [vmem:[%s2827_s4] ss:$0 sm:$0xff] }
 0x123   :  { %v1439_v0 = vpop.f32.mrf.mxu0 }
 0x124   :  { %v1480_v1 = vpop.f32.mrf.mxu1 }
 0x15d   :  { %v1516_v12 = vpop.f32.mrf.mxu0 }
 0x15e   :  { %v1557_v13 = vpop.f32.mrf.mxu1  ;;  %v1517_v16 = vadd.f32 %v1516_v12, %v1476_v11 }
 0x15f   :  { %v1518_v17 = vpop.f32.mrf.mxu0 }
 0x160   :  { %v1559_v15 = vpop.f32.mrf.mxu1  ;;  %v1558_v18 = vadd.f32 %v1557_v13, %v1517_v16  ;;  %v1519_v19 = vadd.f32 %v1518_v17, %v1478_v14 }
 0x161   :  { %v1520_v20 = vpop.f32.mrf.mxu0 }
 0x162   :  { %v1561_v54 = vpop.f32.mrf.mxu1  ;;  %v1560_v58 = vadd.f32 %v1559_v15, %v1519_v19  ;;  %v1724_v21 = vmax.f32 %v1558_v18, 0.0 }
 0x163   :  { %v1521_v22 = vpop.f32.mrf.mxu0 }
 0x164   :  { %v1562_v23 = vpop.f32.mrf.mxu1  ;;  %v1725_v24 = vmax.f32 %v1560_v58, 0.0  ;;  %v1727_v26 = vpack.c.bf16 %v1724_v21, %v1724_v21 }
 0x166   :  { %v1728_v25 = vpack.c.bf16 %v1725_v24, %v1725_v24 }
 0x168   :  { %1961 = vmatprep.mubr.bf16.mxu0 %v1728_v25 }
 0x169   :  { %1962 = vmatmul.mubr.bf16.vlgmr.msra.gmra.mxu0 %v1727_v26 }
 0x17d   :  { %v2249_v27 = vpop.f32.mrf.mxu0 }
 0x17e   :  { %v2271_v28 = vpop.f32.mrf.mxu1 }
 0x17f   :  { %v2250_v29 = vpop.f32.mrf.mxu0 }
 0x180   :  { %v2272_v30 = vpop.f32.mrf.mxu1  ;;  %v2251_v39 = vadd.f32 %v2250_v29, %v2249_v27 }
 0x181   :  { %v2252_v31 = vpop.f32.mrf.mxu0  ;;  %v2273_v41 = vadd.f32 %v2272_v30, %v2271_v28 }
 0x182   :  { %v2274_v34 = vpop.f32.mrf.mxu1  ;;  %v1599_v40 = vadd.f32 %v2251_v39, %v372_v38 }
 0x183   :  { %v2253_v35 = vpop.f32.mrf.mxu0 }
 0x184   :  { %v2275_v36 = vpop.f32.mrf.mxu1  ;;  %v1639_v33 = vadd.f32 %v2273_v41, %v1599_v40 }
 0x19d   :  { %v2293_v42 = vpop.f32.mrf.mxu0 }
 0x19e   :  { %v2315_v44 = vpop.f32.mrf.mxu1 }
 0x19f   :  { %v2294_v45 = vpop.f32.mrf.mxu0 }
 0x1a0   :  { %v2316_v32 = vpop.f32.mrf.mxu1  ;;  %v2295_v46 = vadd.f32 %v2294_v45, %v2293_v42 }
 0x1a1   :  { %v2296_v47 = vpop.f32.mrf.mxu0  ;;  %v2317_v51 = vadd.f32 %v2316_v32, %v2315_v44 }
 0x1a2   :  { %v2318_v48 = vpop.f32.mrf.mxu1  ;;  %v1679_v50 = vadd.f32 %v2295_v46, %v1639_v33 }
 0x1a3   :  { %v2297_v52 = vpop.f32.mrf.mxu0 }
 0x1a4   :  { %v2319_v62 = vpop.f32.mrf.mxu1  ;;  %v1719_v3 = vadd.f32 %v2317_v51, %v1679_v50 }
 0x1a6   :  { %v1726_v53 = vmax.f32 %v1719_v3, 0.0 }
 0x1a8   :  { %v1729_v55 = vpack.c.bf16 %v1726_v53, %v1726_v53 }
 0x1aa   :  { %2369 = vmatmul.mubr.bf16.vlgmr.msra.gmra.mxu1 %v1729_v55 }
 0x229   :  { %v2337_v43 = vpop.f32.mrf.mxu0 }
 0x22b   :  { %v2338_v56 = vpop.f32.mrf.mxu0 }
 0x22c   :  { %v2339_v49 = vadd.f32 %v2338_v56, %v2337_v43 }
 0x22d   :  { %v2340_v57 = vpop.f32.mrf.mxu0 }
 0x22e   :  { %v1964_v61 = vadd.f32 %v2339_v49, %v2208_v60 }
 0x22f   :  { %v2341_v59 = vpop.f32.mrf.mxu0 }
 0x26a   :  { %v2003_v63 = vpop.f32.mrf.mxu1 }
 0x26b   :  { %v2004_v0 = vadd.f32 %v2003_v63, %v1964_v61 }
 0x26c   :  { %v2370_v1 = vpop.f32.mrf.mxu1 }
 0x26d   :  { %2009 = vst [vmem:[%s2828_s5] sm:$0x3] %v2004_v0 }
 0x26e   :  { %v2006_v2 = vpop.f32.mrf.mxu1 }
 0x270   :  { %v2371_v4 = vpop.f32.mrf.mxu1 }
 0x271   :  { %2014 = vsyncpa [#allocation3], 1 }
 0x272   :  { %2015 = vsyncpa [#allocation5], 1 }

</bundles_post_ra>
